<compile_context>
chip_gen: v6e
topology: v6e:2x2x1
jax: 0.10.0
libtpu: 0.0.40
codegen_flags: <defaults>
</compile_context>

<pallas_src>
import functools

import jax
import jax.numpy as jnp
from jax.experimental import pallas as pl
from jax.experimental.pallas import tpu as pltpu


def _round_up(n: int, m: int) -> int:
    return ((n + m - 1) // m) * m


def actor_kernel(xT_ref, w1T_ref, b1_ref, wd_ref, bd_ref, o_ref):
    # xT : (4, TB)  input states, batch on the lane axis (lane-dense)
    # w1T: (H, 4)   first-layer weight, transposed (resident in VMEM)
    # b1 : (H, 1)
    # wd : (1, H)   w2[:,0] - w2[:,1]   (folded 2-class softmax)
    # bd : (1, 1)   b2[0]   - b2[1]
    # o  : (1, TB)  p0 = softmax(logits)[:, 0]; p1 is rebuilt in the wrapper

    # Layer 1 on the MXU: a (H,4)@(4,TB) push is only a handful of vmatmuls and
    # the MXU is otherwise idle, so the VALU slot is freed for everything else.
    h = jnp.dot(w1T_ref[...], xT_ref[...],
                preferred_element_type=jnp.float32,
                precision=jax.lax.Precision.HIGHEST) + b1_ref[...]     # (H, TB)
    h = jnp.maximum(h, 0.0)                                            # ReLU
    # TODO(synk): on v6e/v7x, h could be kept in bf16 (halves VALU + VMEM traffic);
    # kept f32 so the 1e-5 tolerance holds on every generation incl. v5e.

    # Layer 2: single 128-deep contraction (logit difference) on the MXU.
    d = jnp.dot(wd_ref[...], h,
                preferred_element_type=jnp.float32,
                precision=jax.lax.Precision.HIGHEST) + bd_ref[...]     # (1, TB)

    # Softmax over 2 classes == sigmoid(l0 - l1); exp runs on the EUP slot.
    # Single full-lane-width store (no sublane-masked vst).
    o_ref[...] = 1.0 / (1.0 + jnp.exp(-d))


@functools.partial(jax.jit, static_argnames=("tb", "core_parallel"))
def actor_forward(x, w1, b1, w2, b2, *, tb=4096, core_parallel=False):
    """x: (B,4); w1: (4,H); b1: (1,H); w2: (H,2); b2: (1,2) -> probs (B,2)."""
    B, F_in = x.shape
    H = w1.shape[1]

    # Batch tile: lane-dense (multiple of 128), capped at `tb`; pad B to a whole tile.
    tile = min(tb, _round_up(B, 128))
    Bp = _round_up(B, tile)

    # Fused pad + transpose: one scatter instead of pad-then-transpose passes.
    xT = jnp.zeros((F_in, Bp), jnp.float32).at[:, :B].set(x.astype(jnp.float32).T)
    w1T = w1.astype(jnp.float32).T                                      # (H, 4)
    b1c = b1.astype(jnp.float32).reshape(H, 1)                          # (H, 1)
    wd = (w2[:, 0] - w2[:, 1]).astype(jnp.float32).reshape(1, H)        # (1, H)
    bd = (b2.reshape(-1)[0] - b2.reshape(-1)[1]).astype(jnp.float32).reshape(1, 1)

    # Only needed past v5e's 16 MiB scoped-VMEM default (very large tiles).
    cp_kwargs = dict(
        dimension_semantics=(pltpu.CORE_PARALLEL,) if core_parallel else ("parallel",))
    if tile >= 16384:
        cp_kwargs["vmem_limit_bytes"] = int(
            3 * H * tile * 4 + 4 * F_in * tile * 4 + (4 << 20))

    p0 = pl.pallas_call(
        actor_kernel,
        out_shape=jax.ShapeDtypeStruct((1, Bp), jnp.float32),
        grid=(Bp // tile,),
        in_specs=[
            pl.BlockSpec((F_in, tile), lambda i: (0, i)),   # new batch tile per step
            pl.BlockSpec((H, F_in), lambda i: (0, 0)),      # weights resident in VMEM
            pl.BlockSpec((H, 1), lambda i: (0, 0)),
            pl.BlockSpec((1, H), lambda i: (0, 0)),
            pl.BlockSpec((1, 1), lambda i: (0, 0)),
        ],
        out_specs=pl.BlockSpec((1, tile), lambda i: (0, i)),
        compiler_params=pltpu.CompilerParams(**cp_kwargs),
    )(xT, w1T, b1c, wd, bd)

    p0 = p0[0, :B]
    return jnp.stack([p0, 1.0 - p0], axis=-1)               # (B, 2)


def init_params(key):
    # Matches PyTorch nn.Linear default init: U(-1/sqrt(fan_in), 1/sqrt(fan_in))
    k1, k2, k3, k4 = jax.random.split(key, 4)
    bound1 = 1.0 / jnp.sqrt(4.0)
    bound2 = 1.0 / jnp.sqrt(128.0)
    w1 = jax.random.uniform(k1, (4, 128), jnp.float32, -bound1, bound1)
    b1 = jax.random.uniform(k2, (1, 128), jnp.float32, -bound1, bound1)
    w2 = jax.random.uniform(k3, (128, 2), jnp.float32, -bound2, bound2)
    b2 = jax.random.uniform(k4, (1, 2), jnp.float32, -bound2, bound2)
    return w1, b1, w2, b2


def reference(x, w1, b1, w2, b2):
    hi = jax.lax.Precision.HIGHEST
    h = jnp.maximum(jnp.dot(x, w1, precision=hi) + b1, 0.0)
    return jax.nn.softmax(jnp.dot(h, w2, precision=hi) + b2, axis=-1)


if __name__ == "__main__":
    key = jax.random.PRNGKey(0)
    pkey, xkey, xkey2 = jax.random.split(key, 3)
    w1, b1, w2, b2 = init_params(pkey)

    # CartPole-style 4-dim observations, small batch.
    B = 8
    x = jax.random.normal(xkey, (B, 4), jnp.float32)

    out = jax.block_until_ready(actor_forward(x, w1, b1, w2, b2))
    ref = reference(x, w1, b1, w2, b2)
    assert out.shape == (B, 2)
    assert jnp.allclose(out, ref, atol=1e-5, rtol=1e-5)
    assert jnp.allclose(jnp.sum(out, axis=-1), 1.0, atol=1e-5)

    # Exercise the multi-tile grid path (B not a multiple of the tile).
    B2 = 200
    x2 = jax.random.normal(xkey2, (B2, 4), jnp.float32)
    out2 = jax.block_until_ready(actor_forward(x2, w1, b1, w2, b2, tb=128))
    ref2 = reference(x2, w1, b1, w2, b2)
    assert out2.shape == (B2, 2)
    assert jnp.allclose(out2, ref2, atol=1e-5, rtol=1e-5)

    print("KERNEL_OK")
</pallas_src>

<mosaic_0001>
module attributes {stable_mosaic.version = 11 : i64} {
  func.func @actor_kernel(%arg0: i32, %arg1: memref<4x128xf32, #tpu.memory_space<vmem>>, %arg2: memref<128x4xf32, #tpu.memory_space<vmem>>, %arg3: memref<128x1xf32, #tpu.memory_space<vmem>>, %arg4: memref<1x128xf32, #tpu.memory_space<vmem>>, %arg5: memref<1x1xf32, #tpu.memory_space<vmem>>, %arg6: memref<1x128xf32, #tpu.memory_space<vmem>>) attributes {dimension_semantics = [#tpu.dimension_semantics<parallel>], iteration_bounds = array<i64: 1>, scalar_prefetch = 0 : i64, scratch_operands = 0 : i64, tpu.core_type = #tpu.core_type<tc>, window_params = [{transform_indices = @transform_0, window_bounds = array<i64: 4, 128>}, {pipeline_mode = #tpu.pipeline_mode<synchronous>, transform_indices = @transform_1, window_bounds = array<i64: 128, 4>}, {pipeline_mode = #tpu.pipeline_mode<synchronous>, transform_indices = @transform_2, window_bounds = array<i64: 128, 1>}, {pipeline_mode = #tpu.pipeline_mode<synchronous>, transform_indices = @transform_3, window_bounds = array<i64: 1, 128>}, {pipeline_mode = #tpu.pipeline_mode<synchronous>, transform_indices = @transform_4, window_bounds = array<i64: 1, 1>}, {transform_indices = @transform_5, window_bounds = array<i64: 1, 128>}]} {
    %c0 = arith.constant 0 : index
    %c0_0 = arith.constant 0 : index
    %0 = vector.load %arg2[%c0, %c0_0] : memref<128x4xf32, #tpu.memory_space<vmem>>, vector<128x4xf32>
    %c0_1 = arith.constant 0 : index
    %c0_2 = arith.constant 0 : index
    %1 = vector.load %arg1[%c0_1, %c0_2] : memref<4x128xf32, #tpu.memory_space<vmem>>, vector<4x128xf32>
    %cst = arith.constant dense<0.000000e+00> : vector<128x128xf32>
    %2 = tpu.matmul %0, %1, %cst {dimension_numbers = #tpu.dot_dimension_numbers<[1], [0], [0], [1], [0, 0, 1, 1], [], []>, precision = #tpu.contract_precision<fp32>} : vector<128x4xf32>, vector<4x128xf32>, vector<128x128xf32> -> vector<128x128xf32>
    %c0_3 = arith.constant 0 : index
    %c0_4 = arith.constant 0 : index
    %3 = vector.load %arg3[%c0_3, %c0_4] : memref<128x1xf32, #tpu.memory_space<vmem>>, vector<128x1xf32>
    %4 = vector.broadcast %3 : vector<128x1xf32> to vector<128x128xf32>
    %5 = arith.addf %2, %4 : vector<128x128xf32>
    %cst_5 = arith.constant 0.000000e+00 : f32
    %6 = vector.broadcast %cst_5 : f32 to vector<128x128xf32>
    %7 = arith.maximumf %5, %6 : vector<128x128xf32>
    %c0_6 = arith.constant 0 : index
    %c0_7 = arith.constant 0 : index
    %8 = vector.load %arg4[%c0_6, %c0_7] : memref<1x128xf32, #tpu.memory_space<vmem>>, vector<1x128xf32>
    %cst_8 = arith.constant dense<0.000000e+00> : vector<1x128xf32>
    %9 = tpu.matmul %8, %7, %cst_8 {dimension_numbers = #tpu.dot_dimension_numbers<[1], [0], [0], [1], [0, 0, 1, 1], [], []>, precision = #tpu.contract_precision<fp32>} : vector<1x128xf32>, vector<128x128xf32>, vector<1x128xf32> -> vector<1x128xf32>
    %c0_9 = arith.constant 0 : index
    %c0_10 = arith.constant 0 : index
    %10 = vector.load %arg5[%c0_9, %c0_10] : memref<1x1xf32, #tpu.memory_space<vmem>>, vector<1x1xf32>
    %11 = vector.broadcast %10 : vector<1x1xf32> to vector<1x128xf32>
    %12 = arith.addf %9, %11 : vector<1x128xf32>
    %cst_11 = arith.constant 0.000000e+00 : f32
    %13 = vector.broadcast %cst_11 : f32 to vector<1x128xf32>
    %14 = arith.subf %13, %12 : vector<1x128xf32>
    %15 = math.exp %14 : vector<1x128xf32>
    %cst_12 = arith.constant 1.000000e+00 : f32
    %16 = vector.broadcast %cst_12 : f32 to vector<1x128xf32>
    %17 = arith.addf %16, %15 : vector<1x128xf32>
    %cst_13 = arith.constant 1.000000e+00 : f32
    %18 = vector.broadcast %cst_13 : f32 to vector<1x128xf32>
    %19 = arith.divf %18, %17 : vector<1x128xf32>
    %c0_14 = arith.constant 0 : index
    %c0_15 = arith.constant 0 : index
    %20 = vector.load %arg6[%c0_14, %c0_15] : memref<1x128xf32, #tpu.memory_space<vmem>>, vector<1x128xf32>
    tpu.vector_store %arg6[%c0_14, %c0_15], %19 {strides = array<i32>} : memref<1x128xf32, #tpu.memory_space<vmem>>, vector<1x128xf32>,
    return
  }
  func.func @transform_0(%arg0: i32) -> (i32, i32) {
    %c0_i32 = arith.constant 0 : i32
    %c0_i32_0 = arith.constant 0 : i32
    return %c0_i32, %arg0 : i32, i32
  }
  func.func @transform_1(%arg0: i32) -> (i32, i32) {
    %c0_i32 = arith.constant 0 : i32
    %c0_i32_0 = arith.constant 0 : i32
    %c0_i32_1 = arith.constant 0 : i32
    return %c0_i32, %c0_i32_0 : i32, i32
  }
  func.func @transform_2(%arg0: i32) -> (i32, i32) {
    %c0_i32 = arith.constant 0 : i32
    %c0_i32_0 = arith.constant 0 : i32
    %c0_i32_1 = arith.constant 0 : i32
    return %c0_i32, %c0_i32_0 : i32, i32
  }
  func.func @transform_3(%arg0: i32) -> (i32, i32) {
    %c0_i32 = arith.constant 0 : i32
    %c0_i32_0 = arith.constant 0 : i32
    %c0_i32_1 = arith.constant 0 : i32
    return %c0_i32, %c0_i32_0 : i32, i32
  }
  func.func @transform_4(%arg0: i32) -> (i32, i32) {
    %c0_i32 = arith.constant 0 : i32
    %c0_i32_0 = arith.constant 0 : i32
    %c0_i32_1 = arith.constant 0 : i32
    return %c0_i32, %c0_i32_0 : i32, i32
  }
  func.func @transform_5(%arg0: i32) -> (i32, i32) {
    %c0_i32 = arith.constant 0 : i32
    %c0_i32_0 = arith.constant 0 : i32
    return %c0_i32, %arg0 : i32, i32
  }
}

</mosaic_0001>

<bundles_post_ra>
// kernel: actor_forward.1
= control target key start
LH: loop header
LB: loop body
LE: loop exit
PB: predicated region body
PF: predicated region fallthrough
CT: control target
= control target key end

     0   :  { %vm184_vm0 = vcmask 1043456   ;;  %vm135_vm1 = vcmask 31744   ;;  %v2537_v3 = vmov 0   ;;  %vm2539_vm2 = vmmov 0   ;;  %s3452_s0 = inlined_call_operand.vmem [shape: f32[4,128], index: 0, kind: input, shape index: {}]   ;;  %s3453_s1 = inlined_call_operand.vmem [shape: f32[128,4], index: 1, kind: input, shape index: {}]   ;;  %s3454_s4 = inlined_call_operand.<no memory space> [shape: f32[1,1], index: 4, kind: input, shape index: {}]   ;;  %s3455_s2 = inlined_call_operand.vmem [shape: f32[128,1], index: 2, kind: input, shape index: {}]   ;;  %s3456_s3 = inlined_call_operand.vmem [shape: f32[1,128], index: 3, kind: input, shape index: {}]   ;;  %s3457_s5 = inlined_call_operand.vmem [shape: f32[1,128], index: 5, kind: output, shape index: {}]  }
   0x1   :  { %v38_v0 = vld [vmem:[%s3452_s0] sm:$0xf]  ;;  %v23_v2 = vld [vmem:[%s3453_s1 + $0x8] sm:$0xff]  ;;  %2531 = vset.pattern.permute.xlu0 %v2537_v3  ;;  %2532 = vset.pattern.permute.xlu1 %v2537_v3  ;;  %v10_v4 = vstv %s3454_s4  ;;  %v24_v8 = vld [vmem:[%s3453_s1 + $0x10] sm:$0xff] }
   0x2   :  { %v22_v1 = vld [vmem:[%s3453_s1] sm:$0xff]  ;;  %v186_v5 = vsel %vm184_vm0, %v38_v0, 0  ;;  %v140_v7 = vsel %vm135_vm1, %v23_v2, 0  ;;  %v25_v9 = vld [vmem:[%s3453_s1 + $0x18] sm:$0xff]  ;;  %11 = vst [vmem:[#allocation2] sm:$0x1] %v10_v4 }
   0x3   :  { %v137_v6 = vsel %vm135_vm1, %v22_v1, 0  ;;  %v26_v10 = vld [vmem:[%s3453_s1 + $0x20] sm:$0xff]  ;;  %v2593_v11 = vand.u32 4294901760, %v186_v5  ;;  %v2597_v13 = vand.u32 4294901760, %v140_v7  ;;  %v143_v14 = vsel %vm135_vm1, %v24_v8, 0  ;;  %v27_v15 = vld [vmem:[%s3453_s1 + $0x28] sm:$0xff] }
   0x4   :  { %v2595_v12 = vand.u32 4294901760, %v137_v6  ;;  %v28_v16 = vld [vmem:[%s3453_s1 + $0x30] sm:$0xff]  ;;  %v2606_v17 = vand.u32 4294901760, %v143_v14  ;;  %v146_v18 = vsel %vm135_vm1, %v25_v9, 0  ;;  %v149_v19 = vsel %vm135_vm1, %v26_v10, 0  ;;  %v54_v33 = vld [vmem:[%s3455_s2 + $0x78] sm:$0xff] }
   0x5   :  { %v152_v20 = vsel %vm135_vm1, %v27_v15, 0  ;;  %2162 = vmatprep.subr.mxu0 %v2593_v11  ;;  %v446_v22 = vsub.f32 %v186_v5, %v2593_v11  ;;  %v2617_v23 = vsub.f32 %v140_v7, %v2597_v13  ;;  %v2620_v24 = vand.u32 4294901760, %v146_v18  ;;  %v52_v34 = vld [vmem:[%s3455_s2 + $0x68] sm:$0xff]  ;;  %132 = vperm.xlu0 %2531, %v54_v33   ;;  %v53_v43 = vld [vmem:[%s3455_s2 + $0x70] sm:$0xff]  ;;  %v51_v44 = vld [vmem:[%s3455_s2 + $0x60] sm:$0xff] }
   0x6   :  { %v2613_v21 = vsub.f32 %v137_v6, %v2595_v12  ;;  %2190 = vmatprep.mubr.f32.mxu1 %v2595_v12  ;;  %2163 = vmatpush3.msra.mxu0 %v2593_v11  ;;  %v2624_v25 = vsub.f32 %v143_v14, %v2606_v17  ;;  %v2626_v26 = vand.u32 4294901760, %v149_v19  ;;  %v2628_v27 = vand.u32 4294901760, %v152_v20  ;;  %v29_v49 = vld [vmem:[%s3453_s1 + $0x38] sm:$0xff]  ;;  %v30_v50 = vld [vmem:[%s3453_s1 + $0x40] sm:$0xff]  ;;  %v31_v51 = vld [vmem:[%s3453_s1 + $0x48] sm:$0xff] }
   0x7   :  { %v155_v28 = vsel %vm135_vm1, %v28_v16, 0  ;;  %v2632_v30 = vand.u32 4294901760, %v446_v22  ;;  %2214 = vmatprep.subr.mxu0 %v446_v22  ;;  %v266_v31 = vand.u32 4294901760, %v2617_v23  ;;  %v2636_v32 = vsub.f32 %v146_v18, %v2620_v24  ;;  %122 = vperm.xlu1 %2532, %v52_v34   ;;  %v32_v60 = vld [vmem:[%s3453_s1 + $0x50] sm:$0xff]  ;;  %v33_v61 = vld [vmem:[%s3453_s1 + $0x58] sm:$0xff]  ;;  %v34_v6 = vld [vmem:[%s3453_s1 + $0x60] sm:$0xff] }
   0x8   :  { %v256_v29 = vand.u32 4294901760, %v2613_v21  ;;  %v276_v35 = vand.u32 4294901760, %v2624_v25  ;;  %v2646_v36 = vsub.f32 %v149_v19, %v2626_v26  ;;  %v2649_v37 = vsub.f32 %v152_v20, %v2628_v27  ;;  %v35_v7 = vld [vmem:[%s3453_s1 + $0x68] sm:$0xff]  ;;  %v36_v20 = vld [vmem:[%s3453_s1 + $0x70] sm:$0xff] }
   0x9   :  { %v2651_v38 = vand.u32 4294901760, %v155_v28  ;;  %v448_v40 = vsub.f32 %v446_v22, %v2632_v30  ;;  %v267_v41 = vsub.f32 %v2617_v23, %v266_v31  ;;  %v286_v42 = vand.u32 4294901760, %v2636_v32  ;;  %127 = vperm.xlu0 %2531, %v53_v43  }
   0xa   :  { %v257_v39 = vsub.f32 %v2613_v21, %v256_v29  ;;  %v277_v45 = vsub.f32 %v2624_v25, %v276_v35  ;;  %v296_v46 = vand.u32 4294901760, %v2646_v36  ;;  %v306_v47 = vand.u32 4294901760, %v2649_v37 }
   0xb   :  { %v2673_v48 = vsub.f32 %v155_v28, %v2651_v38  ;;  %v449_v53 = vand.u32 4294901760, %v448_v40  ;;  %v268_v54 = vand.u32 4294901760, %v267_v41  ;;  %v287_v55 = vsub.f32 %v2636_v32, %v286_v42  ;;  %117 = vperm.xlu1 %2532, %v51_v44   ;;  %v50_v44 = vld [vmem:[%s3455_s2 + $0x58] sm:$0xff] }
   0xc   :  { %v258_v52 = vand.u32 4294901760, %v257_v39  ;;  %v278_v56 = vand.u32 4294901760, %v277_v45  ;;  %v297_v57 = vsub.f32 %v2646_v36, %v296_v46  ;;  %v2693_v58 = vsub.f32 %v2649_v37, %v306_v47  ;;  %v49_v45 = vld [vmem:[%s3455_s2 + $0x50] sm:$0xff] }
   0xd   :  { %v316_v59 = vand.u32 4294901760, %v2673_v48  ;;  %2188 = vmatprep.subr.mxu1 %v449_v53  ;;  %v288_v62 = vand.u32 4294901760, %v287_v55  ;;  %v158_v63 = vsel %vm135_vm1, %v29_v49, 0  ;;  %v161_v0 = vsel %vm135_vm1, %v30_v50, 0  ;;  %112 = vperm.xlu0 %2531, %v50_v44  }
   0xe   :  { %2164 = vmatprep.mubr.f32.mxu0 %v258_v52  ;;  %v164_v1 = vsel %vm135_vm1, %v31_v51, 0  ;;  %2189 = vmatpush3.msra.mxu1 %v449_v53  ;;  %v298_v2 = vand.u32 4294901760, %v297_v57  ;;  %v308_v3 = vand.u32 4294901760, %v2693_v58  ;;  %v2709_v5 = vand.u32 4294901760, %v158_v63  ;;  %v37_v58 = vld [vmem:[%s3453_s1 + $0x78] sm:$0xff] }
   0xf   :  { %2165 = vmatmul.mubr.f32.vlgmr.msra.gmra.mxu0 %v268_v54  ;;  %v317_v4 = vsub.f32 %v2673_v48, %v316_v59  ;;  %2191 = vmatmul.mubr.f32.vlgmr.msra.gmra.mxu1 %v2597_v13  ;;  %v2718_v8 = vand.u32 4294901760, %v161_v0  ;;  %v2720_v9 = vand.u32 4294901760, %v164_v1  ;;  %v167_v10 = vsel %vm135_vm1, %v32_v60, 0 }
  0x10   :  { %2215 = vmatpush3.msra.mxu0 %v446_v22  ;;  %v170_v14 = vsel %vm135_vm1, %v33_v61, 0  ;;  %2240 = vmatprep.subr.mxu1 %v2593_v11  ;;  %v2726_v16 = vsub.f32 %v158_v63, %v2709_v5  ;;  %v2728_v18 = vand.u32 4294901760, %v167_v10  ;;  %v173_v33 = vsel %vm135_vm1, %v34_v6, 0 }
  0x11   :  { %2167 = vmatprep.mubr.f32.mxu0 %v278_v56  ;;  %v318_v15 = vand.u32 4294901760, %v317_v4  ;;  %v2730_v19 = vand.u32 4294901760, %v170_v14  ;;  %2241 = vmatpush3.msra.mxu1 %v2593_v11  ;;  %v2738_v22 = vsub.f32 %v161_v0, %v2718_v8  ;;  %v2741_v28 = vsub.f32 %v164_v1, %v2720_v9  ;;  %v48_v0 = vld [vmem:[%s3455_s2 + $0x48] sm:$0xff]  ;;  %v47_v1 = vld [vmem:[%s3455_s2 + $0x40] sm:$0xff] }
  0x12   :  { %2193 = vmatprep.mubr.f32.mxu1 %v2606_v17  ;;  %v176_v34 = vsel %vm135_vm1, %v35_v7, 0  ;;  %v326_v39 = vand.u32 4294901760, %v2726_v16  ;;  %v2747_v40 = vsub.f32 %v167_v10, %v2728_v18  ;;  %v2752_v43 = vand.u32 4294901760, %v173_v33  ;;  %2266 = vmatprep.subr.mxu0 %v2632_v30 }
  0x13   :  { %2168 = vmatmul.mubr.f32.gmra.mxu0 %v288_v62  ;;  %v2750_v41 = vsub.f32 %v170_v14, %v2730_v19  ;;  %2194 = vmatmul.mubr.f32.gmra.mxu1 %v2620_v24  ;;  %v336_v49 = vand.u32 4294901760, %v2738_v22  ;;  %v346_v50 = vand.u32 4294901760, %v2741_v28  ;;  %v2764_v51 = vand.u32 4294901760, %v176_v34 }
  0x14   :  { %2170 = vmatprep.mubr.f32.mxu0 %v298_v2  ;;  %v179_v52 = vsel %vm135_vm1, %v36_v20, 0  ;;  %2196 = vmatprep.mubr.f32.mxu1 %v2626_v26  ;;  %v327_v53 = vsub.f32 %v2726_v16, %v326_v39  ;;  %v356_v54 = vand.u32 4294901760, %v2747_v40  ;;  %v2773_v55 = vsub.f32 %v173_v33, %v2752_v43  ;;  %v46_v33 = vld [vmem:[%s3455_s2 + $0x38] sm:$0xff] }
  0x15   :  { %2292 = vmatprep.subr.mxu1 %v2593_v11  ;;  %v337_v56 = vsub.f32 %v2738_v22, %v336_v49  ;;  %v2779_v57 = vand.u32 4294901760, %v179_v52  ;;  %107 = vperm.xlu1 %2532, %v49_v45   ;;  %v347_v61 = vsub.f32 %v2741_v28, %v346_v50  ;;  %v366_v62 = vand.u32 4294901760, %v2750_v41 }
  0x16   :  { %v328_v60 = vand.u32 4294901760, %v327_v53  ;;  %v2789_v63 = vsub.f32 %v176_v34, %v2764_v51  ;;  %v376_v4 = vand.u32 4294901760, %v2773_v55  ;;  %v182_v7 = vsel %vm135_vm1, %v37_v58, 0  ;;  %102 = vperm.xlu0 %2531, %v48_v0   ;;  %v45_v34 = vld [vmem:[%s3455_s2 + $0x30] sm:$0xff]  ;;  %v43_v0 = vld [vmem:[%s3455_s2 + $0x20] sm:$0xff] }
  0x17   :  { %2171 = vmatmul.mubr.f32.gmra.mxu0 %v308_v3  ;;  %2197 = vmatmul.mubr.f32.gmra.mxu1 %v2628_v27  ;;  %v338_v2 = vand.u32 4294901760, %v337_v56  ;;  %v357_v3 = vsub.f32 %v2747_v40, %v356_v54  ;;  %v2803_v6 = vsub.f32 %v179_v52, %v2779_v57  ;;  %v2807_v10 = vand.u32 4294901760, %v182_v7 }
  0x18   :  { %2173 = vmatprep.mubr.f32.mxu0 %v318_v15  ;;  %2199 = vmatprep.mubr.f32.mxu1 %v2651_v38  ;;  %v348_v14 = vand.u32 4294901760, %v347_v61  ;;  %v367_v15 = vsub.f32 %v2750_v41, %v366_v62  ;;  %v386_v20 = vand.u32 4294901760, %v2789_v63  ;;  %v377_v45 = vsub.f32 %v2773_v55, %v376_v4  ;;  %v44_v61 = vld [vmem:[%s3455_s2 + $0x28] sm:$0xff] }
  0x19   :  { %97 = vperm.xlu1 %2532, %v47_v1   ;;  %v358_v44 = vand.u32 4294901760, %v357_v3  ;;  %v396_v52 = vand.u32 4294901760, %v2803_v6  ;;  %v2825_v53 = vsub.f32 %v182_v7, %v2807_v10 }
  0x1a   :  { %92 = vperm.xlu0 %2531, %v46_v33   ;;  %v368_v56 = vand.u32 4294901760, %v367_v15  ;;  %v387_v58 = vsub.f32 %v2789_v63, %v386_v20  ;;  %v378_v1 = vand.u32 4294901760, %v377_v45  ;;  %v41_v15 = vld [vmem:[%s3455_s2 + $0x10] sm:$0xff]  ;;  %v39_v45 = vld [vmem:[%s3455_s2] sm:$0xff] }
  0x1b   :  { %2174 = vmatmul.mubr.f32.gmra.mxu0 %v328_v60  ;;  %2200 = vmatmul.mubr.f32.gmra.mxu1 %v2709_v5  ;;  %v406_v60 = vand.u32 4294901760, %v2825_v53 }
  0x1c   :  { %2176 = vmatprep.mubr.f32.mxu0 %v338_v2  ;;  %2202 = vmatprep.mubr.f32.mxu1 %v2718_v8  ;;  %v397_v2 = vsub.f32 %v2803_v6, %v396_v52  ;;  %v388_v3 = vand.u32 4294901760, %v387_v58 }
  0x1d   :  { %87 = vperm.xlu1 %2532, %v45_v34   ;;  %v407_v7 = vsub.f32 %v2825_v53, %v406_v60 }
  0x1e   :  { %82 = vperm.xlu0 %2531, %v44_v61   ;;  %v398_v33 = vand.u32 4294901760, %v397_v2 }
  0x1f   :  { %2177 = vmatmul.mubr.f32.gmra.mxu0 %v348_v14  ;;  %2203 = vmatmul.mubr.f32.gmra.mxu1 %v2720_v9  ;;  %v42_v14 = vld [vmem:[%s3455_s2 + $0x18] sm:$0xff]  ;;  %v408_v34 = vand.u32 4294901760, %v407_v7 }
  0x20   :  { %2179 = vmatprep.mubr.f32.mxu0 %v358_v44  ;;  %2205 = vmatprep.mubr.f32.mxu1 %v2728_v18  ;;  %v40_v44 = vld [vmem:[%s3455_s2 + $0x8] sm:$0xff] }
  0x21   :  { %77 = vperm.xlu1 %2532, %v43_v0  }
  0x22   :  { %72 = vperm.xlu0 %2531, %v42_v14  }
  0x23   :  { %2180 = vmatmul.mubr.f32.gmra.mxu0 %v368_v56  ;;  %2206 = vmatmul.mubr.f32.gmra.mxu1 %v2730_v19  ;;  %v1296_v56 = vld [vmem:[#allocation2] sm:$0x1] }
  0x24   :  { %2182 = vmatprep.mubr.f32.mxu0 %v378_v1  ;;  %2208 = vmatprep.mubr.f32.mxu1 %v2752_v43 }
  0x25   :  { %67 = vperm.xlu1 %2532, %v41_v15  }
  0x26   :  { %62 = vperm.xlu0 %2531, %v40_v44  }
  0x27   :  { %2183 = vmatmul.mubr.f32.gmra.mxu0 %v388_v3  ;;  %2209 = vmatmul.mubr.f32.gmra.mxu1 %v2764_v51 }
  0x28   :  { %2185 = vmatprep.mubr.f32.mxu0 %v398_v33  ;;  %2211 = vmatprep.mubr.f32.mxu1 %v2779_v57 }
  0x29   :  { %57 = vperm.xlu1 %2532, %v39_v45  }
  0x2a   :  { %1299 = vperm.xlu0 %2531, %v1296_v56  }
  0x2b   :  { %2186 = vmatmul.mubr.f32.gmra.mxu0 %v408_v34  ;;  %2212 = vmatmul.mubr.f32.gmra.mxu1 %v2807_v10 }
  0x2c   :  { %2216 = vmatprep.mubr.f32.mxu0 %v2613_v21  ;;  %2242 = vmatprep.mubr.f32.mxu1 %v256_v29 }
  0x2f   :  { %2217 = vmatmul.mubr.f32.vlgmr.msra.gmra.mxu0 %v2617_v23  ;;  %2243 = vmatmul.mubr.f32.vlgmr.msra.gmra.mxu1 %v266_v31 }
  0x30   :  { %2267 = vmatpush3.msra.mxu0 %v2632_v30  ;;  %2293 = vmatpush3.msra.mxu1 %v2593_v11 }
  0x31   :  { %2219 = vmatprep.mubr.f32.mxu0 %v2624_v25  ;;  %2245 = vmatprep.mubr.f32.mxu1 %v276_v35 }
  0x33   :  { %2220 = vmatmul.mubr.f32.gmra.mxu0 %v2636_v32  ;;  %2246 = vmatmul.mubr.f32.gmra.mxu1 %v286_v42 }
  0x34   :  { %2222 = vmatprep.mubr.f32.mxu0 %v2646_v36  ;;  %2248 = vmatprep.mubr.f32.mxu1 %v296_v46 }
  0x37   :  { %2223 = vmatmul.mubr.f32.gmra.mxu0 %v2649_v37  ;;  %2249 = vmatmul.mubr.f32.gmra.mxu1 %v306_v47 }
  0x38   :  { %2225 = vmatprep.mubr.f32.mxu0 %v2673_v48  ;;  %2251 = vmatprep.mubr.f32.mxu1 %v316_v59 }
  0x3b   :  { %2226 = vmatmul.mubr.f32.gmra.mxu0 %v2726_v16  ;;  %2252 = vmatmul.mubr.f32.gmra.mxu1 %v326_v39 }
  0x3c   :  { %2228 = vmatprep.mubr.f32.mxu0 %v2738_v22  ;;  %2254 = vmatprep.mubr.f32.mxu1 %v336_v49 }
  0x3f   :  { %2229 = vmatmul.mubr.f32.gmra.mxu0 %v2741_v28  ;;  %2255 = vmatmul.mubr.f32.gmra.mxu1 %v346_v50 }
  0x40   :  { %2231 = vmatprep.mubr.f32.mxu0 %v2747_v40  ;;  %2257 = vmatprep.mubr.f32.mxu1 %v356_v54 }
  0x43   :  { %2232 = vmatmul.mubr.f32.gmra.mxu0 %v2750_v41  ;;  %2258 = vmatmul.mubr.f32.gmra.mxu1 %v366_v62 }
  0x44   :  { %2234 = vmatprep.mubr.f32.mxu0 %v2773_v55  ;;  %2260 = vmatprep.mubr.f32.mxu1 %v376_v4 }
  0x47   :  { %2235 = vmatmul.mubr.f32.gmra.mxu0 %v2789_v63  ;;  %2261 = vmatmul.mubr.f32.gmra.mxu1 %v386_v20 }
  0x48   :  { %2237 = vmatprep.mubr.f32.mxu0 %v2803_v6  ;;  %2263 = vmatprep.mubr.f32.mxu1 %v396_v52 }
  0x4b   :  { %2238 = vmatmul.mubr.f32.gmra.mxu0 %v2825_v53  ;;  %2264 = vmatmul.mubr.f32.gmra.mxu1 %v406_v60 }
  0x4c   :  { %2268 = vmatprep.mubr.f32.mxu0 %v2595_v12  ;;  %2294 = vmatprep.mubr.f32.mxu1 %v2595_v12 }
  0x4f   :  { %2269 = vmatmul.mubr.f32.vlgmr.msra.gmra.mxu0 %v2597_v13  ;;  %2295 = vmatmul.mubr.f32.vlgmr.msra.gmra.mxu1 %v2597_v13 }
  0x50   :  { %2271 = vmatprep.mubr.f32.mxu0 %v2606_v17  ;;  %2297 = vmatprep.mubr.f32.mxu1 %v2606_v17 }
  0x53   :  { %2272 = vmatmul.mubr.f32.gmra.mxu0 %v2620_v24  ;;  %2298 = vmatmul.mubr.f32.gmra.mxu1 %v2620_v24  ;;  %v3458_v24 = vmov 0.0  }
  0x54   :  { %2274 = vmatprep.mubr.f32.mxu0 %v2626_v26  ;;  %2300 = vmatprep.mubr.f32.mxu1 %v2626_v26 }
  0x55   :  { %2318 = vmatprep.subr.mxu0 %v3458_v24  ;;  %2353 = vmatprep.subr.mxu1 %v3458_v24 }
  0x57   :  { %2275 = vmatmul.mubr.f32.gmra.mxu0 %v2628_v27  ;;  %2301 = vmatmul.mubr.f32.gmra.mxu1 %v2628_v27 }
  0x58   :  { %2277 = vmatprep.mubr.f32.mxu0 %v2651_v38  ;;  %2303 = vmatprep.mubr.f32.mxu1 %v2651_v38 }
  0x5b   :  { %2278 = vmatmul.mubr.f32.gmra.mxu0 %v2709_v5  ;;  %2304 = vmatmul.mubr.f32.gmra.mxu1 %v2709_v5 }
  0x5c   :  { %2280 = vmatprep.mubr.f32.mxu0 %v2718_v8  ;;  %2306 = vmatprep.mubr.f32.mxu1 %v2718_v8 }
  0x5f   :  { %2281 = vmatmul.mubr.f32.gmra.mxu0 %v2720_v9  ;;  %2307 = vmatmul.mubr.f32.gmra.mxu1 %v2720_v9 }
  0x60   :  { %2283 = vmatprep.mubr.f32.mxu0 %v2728_v18  ;;  %2309 = vmatprep.mubr.f32.mxu1 %v2728_v18 }
  0x63   :  { %2284 = vmatmul.mubr.f32.gmra.mxu0 %v2730_v19  ;;  %2310 = vmatmul.mubr.f32.gmra.mxu1 %v2730_v19 }
  0x64   :  { %2286 = vmatprep.mubr.f32.mxu0 %v2752_v43  ;;  %2312 = vmatprep.mubr.f32.mxu1 %v2752_v43 }
  0x67   :  { %2287 = vmatmul.mubr.f32.gmra.mxu0 %v2764_v51  ;;  %2313 = vmatmul.mubr.f32.gmra.mxu1 %v2764_v51 }
  0x68   :  { %2289 = vmatprep.mubr.f32.mxu0 %v2779_v57  ;;  %2315 = vmatprep.mubr.f32.mxu1 %v2779_v57 }
  0x6b   :  { %2290 = vmatmul.mubr.f32.gmra.mxu0 %v2807_v10  ;;  %2316 = vmatmul.mubr.f32.gmra.mxu1 %v2807_v10 }
  0x6c   :  { %2350 = vmatprep.mubr.msk.f32.mxu0 %vm2539_vm2, %v3458_v24  ;;  %2385 = vmatprep.mubr.msk.f32.mxu1 %vm2539_vm2, %v3458_v24 }
  0x80   :  { %v2945_v11 = vpop.permute.xlu0 %132 }
  0x82   :  { %v2947_v12 = vpop.permute.xlu1 %122 }
  0x84   :  { %v2949_v13 = vpop.permute.xlu0 %127 }
  0x86   :  { %v2951_v17 = vpop.permute.xlu1 %117 }
  0x88   :  { %v113_v21 = vpop.permute.xlu0 %112 }
  0x90   :  { %v108_v23 = vpop.permute.xlu1 %107 }
  0x91   :  { %v103_v25 = vpop.permute.xlu0 %102 }
  0x94   :  { %v98_v26 = vpop.permute.xlu1 %97 }
  0x95   :  { %v93_v27 = vpop.permute.xlu0 %92 }
  0x98   :  { %v88_v29 = vpop.permute.xlu1 %87 }
  0x99   :  { %v83_v30 = vpop.permute.xlu0 %82 }
  0x9c   :  { %v78_v31 = vpop.permute.xlu1 %77 }
  0x9d   :  { %v73_v32 = vpop.permute.xlu0 %72 }
  0xa0   :  { %v68_v35 = vpop.permute.xlu1 %67 }
  0xa1   :  { %v63_v36 = vpop.permute.xlu0 %62 }
  0xa4   :  { %v58_v38 = vpop.permute.xlu1 %57 }
  0xcf   :  { %v2166_v37 = vpop.f32.mrf.mxu0  ;;  %v2192_v46 = vpop.f32.mrf.mxu1 }
  0xd0   :  { %v271_v42 = vadd.f32 %v2166_v37, %v63_v36 }
  0xd1   :  { %v260_v47 = vpop.f32.mrf.mxu0  ;;  %v486_v5 = vpop.f32.mrf.mxu1 }
  0xd2   :  { %v493_v48 = vadd.f32 %v2192_v46, %v271_v42  ;;  %v261_v59 = vadd.f32 %v260_v47, %v58_v38 }
  0xd3   :  { %v2169_v8 = vpop.f32.mrf.mxu0  ;;  %v2195_v18 = vpop.f32.mrf.mxu1 }
  0xd4   :  { %v487_v9 = vadd.f32 %v486_v5, %v261_v59  ;;  %v291_v16 = vadd.f32 %v2169_v8, %v73_v32 }
  0xd5   :  { %v280_v19 = vpop.f32.mrf.mxu0  ;;  %v498_v39 = vpop.f32.mrf.mxu1 }
  0xd6   :  { %v505_v22 = vadd.f32 %v2195_v18, %v291_v16  ;;  %v281_v28 = vadd.f32 %v280_v19, %v68_v35 }
  0xd7   :  { %v2172_v40 = vpop.f32.mrf.mxu0  ;;  %v2198_v49 = vpop.f32.mrf.mxu1 }
  0xd8   :  { %v499_v41 = vadd.f32 %v498_v39, %v281_v28  ;;  %v311_v43 = vadd.f32 %v2172_v40, %v83_v30 }
  0xd9   :  { %v300_v50 = vpop.f32.mrf.mxu0  ;;  %v510_v55 = vpop.f32.mrf.mxu1 }
  0xda   :  { %v517_v51 = vadd.f32 %v2198_v49, %v311_v43  ;;  %v301_v54 = vadd.f32 %v300_v50, %v78_v31 }
  0xdb   :  { %v2175_v57 = vpop.f32.mrf.mxu0  ;;  %v2201_v4 = vpop.f32.mrf.mxu1 }
  0xdc   :  { %v511_v62 = vadd.f32 %v510_v55, %v301_v54  ;;  %v331_v63 = vadd.f32 %v2175_v57, %v93_v27 }
  0xdd   :  { %v320_v6 = vpop.f32.mrf.mxu0  ;;  %v522_v52 = vpop.f32.mrf.mxu1 }
  0xde   :  { %v2959_v10 = vadd.f32 %v2201_v4, %v331_v63  ;;  %v321_v20 = vadd.f32 %v320_v6, %v88_v29 }
  0xdf   :  { %v2178_v53 = vpop.f32.mrf.mxu0  ;;  %v2204_v61 = vpop.f32.mrf.mxu1 }
  0xe0   :  { %v2961_v58 = vadd.f32 %v522_v52, %v321_v20  ;;  %v351_v60 = vadd.f32 %v2178_v53, %v103_v25 }
  0xe1   :  { %v340_v0 = vpop.f32.mrf.mxu0  ;;  %v534_v3 = vpop.f32.mrf.mxu1 }
  0xe2   :  { %v2963_v1 = vadd.f32 %v2204_v61, %v351_v60  ;;  %v341_v2 = vadd.f32 %v340_v0, %v98_v26 }
  0xe3   :  { %v2181_v7 = vpop.f32.mrf.mxu0  ;;  %v2207_v33 = vpop.f32.mrf.mxu1 }
  0xe4   :  { %v2965_v14 = vadd.f32 %v534_v3, %v341_v2  ;;  %v371_v15 = vadd.f32 %v2181_v7, %v113_v21 }
  0xe5   :  { %v360_v34 = vpop.f32.mrf.mxu0  ;;  %v546_v56 = vpop.f32.mrf.mxu1 }
  0xe6   :  { %v2967_v44 = vadd.f32 %v2207_v33, %v371_v15  ;;  %v361_v45 = vadd.f32 %v360_v34, %v108_v23 }
  0xe7   :  { %v2184_v27 = vpop.f32.mrf.mxu0  ;;  %v2210_v30 = vpop.f32.mrf.mxu1 }
  0xe8   :  { %v2969_v29 = vadd.f32 %v546_v56, %v361_v45  ;;  %v391_v25 = vadd.f32 %v2184_v27, %v2947_v12 }
  0xe9   :  { %v380_v31 = vpop.f32.mrf.mxu0  ;;  %v558_v35 = vpop.f32.mrf.mxu1 }
  0xea   :  { %v2972_v32 = vadd.f32 %v2210_v30, %v391_v25  ;;  %v381_v26 = vadd.f32 %v380_v31, %v2951_v17 }
  0xeb   :  { %v2975_v36 = vpop.f32.mrf.mxu0  ;;  %v2979_v37 = vpop.f32.mrf.mxu1 }
  0xec   :  { %v2977_v21 = vadd.f32 %v558_v35, %v381_v26 }
  0xed   :  { %v2981_v23 = vpop.f32.mrf.mxu0  ;;  %v2983_v38 = vpop.f32.mrf.mxu1 }
  0xef   :  { %v2218_v42 = vpop.f32.mrf.mxu0  ;;  %v2244_v12 = vpop.f32.mrf.mxu1 }
  0xf0   :  { %v658_v46 = vadd.f32 %v2218_v42, %v493_v48 }
  0xf1   :  { %v650_v47 = vpop.f32.mrf.mxu0  ;;  %v829_v8 = vpop.f32.mrf.mxu1 }
  0xf2   :  { %v2985_v59 = vadd.f32 %v2244_v12, %v658_v46  ;;  %v651_v5 = vadd.f32 %v650_v47, %v487_v9 }
  0xf3   :  { %v2221_v17 = vpop.f32.mrf.mxu0  ;;  %v2247_v19 = vpop.f32.mrf.mxu1 }
  0xf4   :  { %v2987_v16 = vadd.f32 %v829_v8, %v651_v5  ;;  %v672_v18 = vadd.f32 %v2221_v17, %v505_v22 }
  0xf5   :  { %v664_v28 = vpop.f32.mrf.mxu0  ;;  %v845_v43 = vpop.f32.mrf.mxu1 }
  0xf6   :  { %3460 = vst [vmem:[#allocation3_spill] sm:$0xff] %v2987_v16  ;;  %v2989_v39 = vadd.f32 %v2247_v19, %v672_v18  ;;  %v665_v40 = vadd.f32 %v664_v28, %v499_v41 }
  0xf7   :  { %v2224_v49 = vpop.f32.mrf.mxu0  ;;  %v2250_v54 = vpop.f32.mrf.mxu1 }
  0xf8   :  { %v2991_v50 = vadd.f32 %v845_v43, %v665_v40  ;;  %v686_v48 = vadd.f32 %v2224_v49, %v517_v51  ;;  %v411_v49 = vadd.f32 %v2975_v36, %v2945_v11 }
  0xf9   :  { %v678_v55 = vpop.f32.mrf.mxu0  ;;  %v861_v63 = vpop.f32.mrf.mxu1 }
  0xfa   :  { %v2993_v57 = vadd.f32 %v2250_v54, %v686_v48  ;;  %v679_v9 = vadd.f32 %v678_v55, %v511_v62 }
  0xfb   :  { %v2227_v4 = vpop.f32.mrf.mxu0  ;;  %v2997_v22 = vpop.f32.mrf.mxu1 }
  0xfc   :  { %v2995_v6 = vadd.f32 %v861_v63, %v679_v9  ;;  %v401_v9 = vadd.f32 %v2981_v23, %v2949_v13 }
  0xfd   :  { %v692_v20 = vpop.f32.mrf.mxu0  ;;  %v2999_v52 = vpop.f32.mrf.mxu1 }
  0xff   :  { %v2230_v41 = vpop.f32.mrf.mxu0  ;;  %v2256_v53 = vpop.f32.mrf.mxu1 }
 0x101   :  { %v706_v60 = vpop.f32.mrf.mxu0  ;;  %v893_v61 = vpop.f32.mrf.mxu1 }
 0x102   :  { %v707_v11 = vadd.f32 %v706_v60, %v2965_v14 }
 0x103   :  { %v2233_v0 = vpop.f32.mrf.mxu0  ;;  %v2259_v51 = vpop.f32.mrf.mxu1 }
 0x104   :  { %v728_v48 = vadd.f32 %v2233_v0, %v2967_v44  ;;  %v571_v0 = vadd.f32 %v2983_v38, %v401_v9  ;;  %v894_v14 = vadd.f32 %v893_v61, %v707_v11 }
 0x105   :  { %v720_v2 = vpop.f32.mrf.mxu0  ;;  %v909_v3 = vpop.f32.mrf.mxu1 }
 0x106   :  { %v721_v63 = vadd.f32 %v720_v2, %v2969_v29  ;;  %v918_v16 = vadd.f32 %v2259_v51, %v728_v48 }
 0x107   :  { %v2236_v7 = vpop.f32.mrf.mxu0  ;;  %v2262_v15 = vpop.f32.mrf.mxu1 }
 0x108   :  { %v910_v13 = vadd.f32 %v909_v3, %v721_v63 }
 0x109   :  { %v734_v62 = vpop.f32.mrf.mxu0  ;;  %v925_v33 = vpop.f32.mrf.mxu1 }
 0x10a   :  { %v735_v44 = vadd.f32 %v734_v62, %v2977_v21 }
 0x10b   :  { %v2239_v34 = vpop.f32.mrf.mxu0  ;;  %v2265_v45 = vpop.f32.mrf.mxu1 }
 0x10c   :  { %v926_v60 = vadd.f32 %v925_v33, %v735_v44 }
 0x10d   :  { %v748_v56 = vpop.f32.mrf.mxu0  ;;  %v941_v27 = vpop.f32.mrf.mxu1 }
 0x10e   :  { %v749_v51 = vadd.f32 %v748_v56, %v571_v0 }
 0x10f   :  { %v3001_v25 = vpop.f32.mrf.mxu0  ;;  %v3003_v30 = vpop.f32.mrf.mxu1 }
 0x110   :  { %3461 = vst [vmem:[#allocation4_spill] sm:$0xff] %v3003_v30  ;;  %v742_v30 = vadd.f32 %v2236_v7, %v2972_v32 }
 0x111   :  { %v3005_v31 = vpop.f32.mrf.mxu0  ;;  %v3007_v26 = vpop.f32.mrf.mxu1 }
 0x112   :  { %3462 = vst [vmem:[#allocation5_spill] sm:$0xff] %v3005_v31  ;;  %3463 = vst [vmem:[#allocation6_spill] sm:$0xff] %v3007_v26  ;;  %v714_v26 = vadd.f32 %v2230_v41, %v2963_v1  ;;  %v577_v31 = vadd.f32 %v2979_v37, %v411_v49  ;;  %v700_v1 = vadd.f32 %v2227_v4, %v2959_v10 }
 0x113   :  { %v3009_v35 = vpop.f32.mrf.mxu0  ;;  %v3011_v42 = vpop.f32.mrf.mxu1  ;;  %v934_v32 = vadd.f32 %v2262_v15, %v742_v30  ;;  %v693_v37 = vadd.f32 %v692_v20, %v2961_v58  ;;  %v942_v58 = vadd.f32 %v941_v27, %v749_v51 }
 0x114   :  { %3464 = vst [vmem:[#allocation7_spill] sm:$0xff] %v3011_v42  ;;  %v756_v23 = vadd.f32 %v2239_v34, %v577_v31  ;;  %v902_v41 = vadd.f32 %v2256_v53, %v714_v26 }
 0x115   :  { %v3013_v46 = vpop.f32.mrf.mxu0  ;;  %v3015_v12 = vpop.f32.mrf.mxu1  ;;  %v878_v15 = vadd.f32 %v2999_v52, %v693_v37 }
 0x116   :  { %3465 = vst [vmem:[#allocation8_spill] sm:$0xff] %v3015_v12  ;;  %v950_v38 = vadd.f32 %v2265_v45, %v756_v23 }
 0x117   :  { %v3017_v47 = vpop.f32.mrf.mxu0  ;;  %v3019_v5 = vpop.f32.mrf.mxu1 }
 0x119   :  { %v3021_v8 = vpop.f32.mrf.mxu0  ;;  %v3023_v17 = vpop.f32.mrf.mxu1 }
 0x11a   :  { %3466 = vst [vmem:[#allocation9_spill] sm:$0xff] %v3023_v17 }
 0x11b   :  { %v2279_v18 = vpop.f32.mrf.mxu0  ;;  %v3025_v19 = vpop.f32.mrf.mxu1 }
 0x11d   :  { %v1059_v28 = vpop.f32.mrf.mxu0  ;;  %v3027_v40 = vpop.f32.mrf.mxu1 }
 0x11f   :  { %v2282_v43 = vpop.f32.mrf.mxu0  ;;  %v2308_v54 = vpop.f32.mrf.mxu1 }
 0x120   :  { %v1078_v21 = vadd.f32 %v2282_v43, %v902_v41 }
 0x121   :  { %v1071_v55 = vpop.f32.mrf.mxu0  ;;  %v1233_v24 = vpop.f32.mrf.mxu1 }
 0x122   :  { %v1072_v31 = vadd.f32 %v1071_v55, %v894_v14  ;;  %v1240_v33 = vadd.f32 %v2308_v54, %v1078_v21 }
 0x123   :  { %v2285_v12 = vpop.f32.mrf.mxu0  ;;  %v2311_v42 = vpop.f32.mrf.mxu1 }
 0x124   :  { %v1090_v29 = vadd.f32 %v2285_v12, %v918_v16  ;;  %v886_v16 = vadd.f32 %v2997_v22, %v700_v1  ;;  %v1060_v22 = vadd.f32 %v1059_v28, %v878_v15  ;;  %v1234_v55 = vadd.f32 %v1233_v24, %v1072_v31  ;;  %v3470_v15 = vld [vmem:[#allocation3_spill] sm:$0xff] }
 0x125   :  { %v1083_v36 = vpop.f32.mrf.mxu0  ;;  %v1245_v2 = vpop.f32.mrf.mxu1  ;;  %v1288_v54 = vmax.f32 %v1240_v33, 0.0 }
 0x126   :  { %v1084_v49 = vadd.f32 %v1083_v36, %v910_v13  ;;  %v1252_v3 = vadd.f32 %v2311_v42, %v1090_v29  ;;  %v1066_v61 = vadd.f32 %v2279_v18, %v886_v16  ;;  %v1054_v36 = vadd.f32 %v3017_v47, %v2993_v57 }
 0x127   :  { %v2288_v7 = vpop.f32.mrf.mxu0  ;;  %v2314_v48 = vpop.f32.mrf.mxu1  ;;  %v1030_v29 = vadd.f32 %v3001_v25, %v2985_v59  ;;  %v1048_v57 = vadd.f32 %v3021_v8, %v2995_v6  ;;  %v3066_v47 = vadd.f32 %v3027_v40, %v1060_v22  ;;  %v1042_v59 = vadd.f32 %v3009_v35, %v2989_v39  ;;  %v3468_v35 = vld [vmem:[#allocation9_spill] sm:$0xff] }
 0x128   :  { %v1102_v62 = vadd.f32 %v2288_v7, %v934_v32  ;;  %v1246_v20 = vadd.f32 %v1245_v2, %v1084_v49  ;;  %v1290_v45 = vmax.f32 %v1252_v3, 0.0  ;;  %v3050_v18 = vadd.f32 %v3025_v19, %v1066_v61 }
 0x129   :  { %v1095_v17 = vpop.f32.mrf.mxu0  ;;  %v1257_v34 = vpop.f32.mrf.mxu1  ;;  %v1287_v19 = vmax.f32 %v1234_v55, 0.0  ;;  %v3082_v6 = vadd.f32 %v3019_v5, %v1054_v36  ;;  %v3085_v8 = vand.u32 4294901760, %v1288_v54  ;;  %v3467_v40 = vmov 0.0   ;;  %v3474_v36 = vld [vmem:[#allocation6_spill] sm:$0xff] }
 0x12a   :  { %v1264_v10 = vadd.f32 %v2314_v48, %v1102_v62  ;;  %v1096_v4 = vadd.f32 %v1095_v17, %v926_v60  ;;  %v1289_v44 = vmax.f32 %v1246_v20, 0.0  ;;  %v3054_v13 = vand.u32 4294901760, %v1290_v45 }
 0x12b   :  { %v2291_v53 = vpop.f32.mrf.mxu0  ;;  %v2317_v30 = vpop.f32.mrf.mxu1  ;;  %v1286_v25 = vmax.f32 %v3050_v18, 0.0  ;;  %v1036_v39 = vadd.f32 %v3013_v46, %v2991_v50  ;;  %v3100_v5 = vadd.f32 %v3468_v35, %v1048_v57  ;;  %v1285_v48 = vmax.f32 %v3066_v47, 0.0  ;;  %v3469_v46 = vld [vmem:[#allocation7_spill] sm:$0xff] }
 0x12c   :  { %v1114_v56 = vadd.f32 %v2291_v53, %v950_v38  ;;  %v1292_v26 = vmax.f32 %v1264_v10, 0.0  ;;  %v1258_v12 = vadd.f32 %v1257_v34, %v1096_v4  ;;  %v3068_v2 = vand.u32 4294901760, %v1289_v44 }
 0x12d   :  { %v1107_v43 = vpop.f32.mrf.mxu0  ;;  %v1269_v63 = vpop.f32.mrf.mxu1  ;;  %v3089_v7 = vsub.f32 %v1290_v45, %v3054_v13  ;;  %v3103_v14 = vand.u32 4294901760, %v1287_v19  ;;  %v3116_v38 = vadd.f32 %v3469_v46, %v1042_v59  ;;  %v1284_v3 = vmax.f32 %v3082_v6, 0.0 }
 0x12e   :  { %v1276_v42 = vadd.f32 %v2317_v30, %v1114_v56  ;;  %v1108_v9 = vadd.f32 %v1107_v43, %v942_v58  ;;  %v3045_v11 = vand.u32 4294901760, %v1292_v26  ;;  %v1291_v17 = vmax.f32 %v1258_v12, 0.0  ;;  %v3471_v58 = vld [vmem:[#allocation5_spill] sm:$0xff]  ;;  %v3472_v56 = vld [vmem:[#allocation8_spill] sm:$0xff] }
 0x12f   :  { %v3107_v60 = vsub.f32 %v1289_v44, %v3068_v2  ;;  %v3119_v34 = vand.u32 4294901760, %v1286_v25  ;;  %v3122_v16 = vsub.f32 %v1288_v54, %v3085_v8  ;;  %v1428_v31 = vand.u32 4294901760, %v3089_v7 }
 0x130   :  { %v1294_v52 = vmax.f32 %v1276_v42, 0.0  ;;  %v1270_v27 = vadd.f32 %v1269_v63, %v1108_v9  ;;  %v3052_v0 = vand.u32 4294901760, %v1291_v17  ;;  %v3057_v28 = vsub.f32 %v1292_v26, %v3045_v11  ;;  %v1295_v42 = vld [vmem:[%s3456_s3] sm:$0x1]  ;;  %v3473_v9 = vld [vmem:[#allocation4_spill] sm:$0xff] }
 0x131   :  { %v1024_v20 = vadd.f32 %v3471_v58, %v3470_v15  ;;  %v3136_v30 = vadd.f32 %v3472_v56, %v1036_v39  ;;  %v1283_v61 = vmax.f32 %v3100_v5, 0.0  ;;  %v3139_v33 = vand.u32 4294901760, %v1285_v48 }
 0x132   :  { %v3059_v24 = vand.u32 4294901760, %v1294_v52  ;;  %v1293_v23 = vmax.f32 %v1270_v27, 0.0  ;;  %v3071_v1 = vsub.f32 %v1291_v17, %v3052_v0  ;;  %v1414_v37 = vand.u32 4294901760, %v3057_v28 }
 0x133   :  { %v3143_v26 = vsub.f32 %v1287_v19, %v3103_v14  ;;  %v1435_v12 = vand.u32 4294901760, %v3107_v60  ;;  %v3154_v63 = vadd.f32 %v3473_v9, %v1030_v29  ;;  %v1282_v22 = vmax.f32 %v3116_v38, 0.0 }
 0x134   :  { %v3074_v41 = vsub.f32 %v1294_v52, %v3059_v24  ;;  %v3076_v32 = vand.u32 4294901760, %v1293_v23  ;;  %2319 = vmatpush3.msra.mxu0 %v3059_v24  ;;  %v1421_v21 = vand.u32 4294901760, %v3071_v1  ;;  %v1415_v10 = vsub.f32 %v3057_v28, %v1414_v37 }
 0x135   :  { %2320 = vmatprep.subr.mxu0 %v3467_v40  ;;  %v3157_v55 = vand.u32 4294901760, %v1284_v3  ;;  %v3162_v17 = vsub.f32 %v1286_v25, %v3119_v34  ;;  %v1442_v44 = vand.u32 4294901760, %v3122_v16  ;;  %v1429_v52 = vsub.f32 %v3089_v7, %v1428_v31 }
 0x136   :  { %v1400_v51 = vand.u32 4294901760, %v3074_v41  ;;  %v3094_v49 = vsub.f32 %v1293_v23, %v3076_v32  ;;  %2321 = vmatpush3.msra.mxu0 %v3076_v32  ;;  %v1422_v43 = vsub.f32 %v3071_v1, %v1421_v21  ;;  %v1416_v27 = vand.u32 4294901760, %v1415_v10 }
 0x137   :  { %2322 = vmatprep.subr.mxu0 %v3467_v40  ;;  %v3170_v18 = vadd.f32 %v3474_v36, %v1024_v20  ;;  %v1281_v54 = vmax.f32 %v3136_v30, 0.0  ;;  %v3173_v23 = vand.u32 4294901760, %v1283_v61  ;;  %v3177_v29 = vand.u32 4294901760, %v1295_v42 }
 0x138   :  { %v1401_v62 = vsub.f32 %v3074_v41, %v1400_v51  ;;  %v1407_v50 = vand.u32 4294901760, %v3094_v49  ;;  %2323 = vmatpush3.msra.mxu0 %v3045_v11  ;;  %v3180_v57 = vsub.f32 %v1285_v48, %v3139_v33  ;;  %v1449_v47 = vand.u32 4294901760, %v3143_v26 }
 0x139   :  { %2324 = vmatprep.subr.mxu0 %v3467_v40  ;;  %v1436_v19 = vsub.f32 %v3107_v60, %v1435_v12  ;;  %v1423_v59 = vand.u32 4294901760, %v1422_v43  ;;  %v1280_v6 = vmax.f32 %v3154_v63, 0.0  ;;  %v3188_v25 = vand.u32 4294901760, %v1282_v22 }
 0x13a   :  { %v1408_v4 = vsub.f32 %v3094_v49, %v1407_v50  ;;  %2325 = vmatpush3.msra.mxu0 %v3052_v0  ;;  %v1402_v53 = vand.u32 4294901760, %v1401_v62  ;;  %v3193_v39 = vsub.f32 %v1284_v3, %v3157_v55  ;;  %v1456_v35 = vand.u32 4294901760, %v3162_v17 }
 0x13b   :  { %2326 = vmatprep.subr.mxu0 %v3467_v40  ;;  %v1443_v5 = vsub.f32 %v3122_v16, %v1442_v44  ;;  %v1430_v48 = vand.u32 4294901760, %v1429_v52  ;;  %v1279_v62 = vmax.f32 %v3170_v18, 0.0  ;;  %v3201_v46 = vand.u32 4294901760, %v1281_v54 }
 0x13c   :  { %2327 = vmatpush3.msra.mxu0 %v3054_v13  ;;  %2354 = vmatpush3.msra.mxu1 %v1402_v53  ;;  %v1409_v45 = vand.u32 4294901760, %v1408_v4  ;;  %v3206_v38 = vsub.f32 %v1295_v42, %v3177_v29  ;;  %v3209_v3 = vsub.f32 %v1283_v61, %v3173_v23  ;;  %v1463_v10 = vand.u32 4294901760, %v3180_v57 }
 0x13d   :  { %2328 = vmatprep.subr.mxu0 %v3467_v40  ;;  %2355 = vmatprep.subr.mxu1 %v3467_v40  ;;  %v1450_v4 = vsub.f32 %v3143_v26, %v1449_v47  ;;  %v1437_v53 = vand.u32 4294901760, %v1436_v19  ;;  %v3216_v15 = vand.u32 4294901760, %v1280_v6  ;;  %v3221_v58 = vsub.f32 %v1282_v22, %v3188_v25 }
 0x13e   :  { %2329 = vmatpush3.msra.mxu0 %v3068_v2  ;;  %2356 = vmatpush3.msra.mxu1 %v1409_v45  ;;  %v1470_v20 = vand.u32 4294901760, %v3193_v39  ;;  %v1457_v56 = vsub.f32 %v3162_v17, %v1456_v35  ;;  %v1444_v30 = vand.u32 4294901760, %v1443_v5  ;;  %v3228_v61 = vand.u32 4294901760, %v1279_v62 }
 0x13f   :  { %2330 = vmatprep.subr.mxu0 %v3467_v40  ;;  %2357 = vmatprep.subr.mxu1 %v3467_v40  ;;  %v1389_v43 = vand.u32 4294901760, %v3206_v38  ;;  %v3234_v45 = vsub.f32 %v1281_v54, %v3201_v46  ;;  %v1477_v42 = vand.u32 4294901760, %v3209_v3  ;;  %v1464_v9 = vsub.f32 %v3180_v57, %v1463_v10 }
 0x140   :  { %2331 = vmatpush3.msra.mxu0 %v3085_v8  ;;  %2358 = vmatpush3.msra.mxu1 %v1416_v27  ;;  %v1451_v63 = vand.u32 4294901760, %v1450_v4  ;;  %v3244_v22 = vsub.f32 %v1280_v6, %v3216_v15  ;;  %v1484_v52 = vand.u32 4294901760, %v3221_v58  ;;  %v1471_v27 = vsub.f32 %v3193_v39, %v1470_v20 }
 0x141   :  { %2332 = vmatprep.subr.mxu0 %v3467_v40  ;;  %2359 = vmatprep.subr.mxu1 %v3467_v40  ;;  %v1458_v36 = vand.u32 4294901760, %v1457_v56  ;;  %v1390_v18 = vsub.f32 %v3206_v38, %v1389_v43  ;;  %v3257_v54 = vsub.f32 %v1279_v62, %v3228_v61  ;;  %v1491_v19 = vand.u32 4294901760, %v3234_v45 }
 0x142   :  { %2333 = vmatpush3.msra.mxu0 %v3103_v14  ;;  %2360 = vmatpush3.msra.mxu1 %v1423_v59  ;;  %v1478_v59 = vsub.f32 %v3209_v3, %v1477_v42  ;;  %v1465_v6 = vand.u32 4294901760, %v1464_v9  ;;  %v1498_v5 = vand.u32 4294901760, %v3244_v22  ;;  %v1472_v62 = vand.u32 4294901760, %v1471_v27 }
 0x143   :  { %2334 = vmatprep.subr.mxu0 %v3467_v40  ;;  %2361 = vmatprep.subr.mxu1 %v3467_v40  ;;  %v1391_v4 = vand.u32 4294901760, %v1390_v18  ;;  %v1492_v56 = vsub.f32 %v3234_v45, %v1491_v19 }
 0x144   :  { %2335 = vmatpush3.msra.mxu0 %v3119_v34  ;;  %2362 = vmatpush3.msra.mxu1 %v1430_v48  ;;  %v1485_v48 = vsub.f32 %v3221_v58, %v1484_v52  ;;  %v1499_v9 = vsub.f32 %v3244_v22, %v1498_v5 }
 0x145   :  { %2336 = vmatprep.subr.mxu0 %v3467_v40  ;;  %2363 = vmatprep.subr.mxu1 %v3467_v40 }
 0x146   :  { %2337 = vmatpush3.msra.mxu0 %v3139_v33  ;;  %2364 = vmatpush3.msra.mxu1 %v1437_v53  ;;  %v1505_v53 = vand.u32 4294901760, %v3257_v54  ;;  %v1500_v18 = vand.u32 4294901760, %v1499_v9 }
 0x147   :  { %2338 = vmatprep.subr.mxu0 %v3467_v40  ;;  %2365 = vmatprep.subr.mxu1 %v3467_v40 }
 0x148   :  { %2339 = vmatpush3.msra.mxu0 %v3157_v55  ;;  %2366 = vmatpush3.msra.mxu1 %v1444_v30  ;;  %v1479_v30 = vand.u32 4294901760, %v1478_v59  ;;  %v1506_v27 = vsub.f32 %v3257_v54, %v1505_v53 }
 0x149   :  { %2340 = vmatprep.subr.mxu0 %v3467_v40  ;;  %2367 = vmatprep.subr.mxu1 %v3467_v40 }
 0x14a   :  { %2341 = vmatpush3.msra.mxu0 %v3173_v23  ;;  %2368 = vmatpush3.msra.mxu1 %v1451_v63  ;;  %v1486_v63 = vand.u32 4294901760, %v1485_v48  ;;  %v1507_v59 = vand.u32 4294901760, %v1506_v27 }
 0x14b   :  { %2342 = vmatprep.subr.mxu0 %v3467_v40  ;;  %2369 = vmatprep.subr.mxu1 %v3467_v40 }
 0x14c   :  { %2343 = vmatpush3.msra.mxu0 %v3188_v25  ;;  %2370 = vmatpush3.msra.mxu1 %v1458_v36  ;;  %v1493_v36 = vand.u32 4294901760, %v1492_v56 }
 0x14d   :  { %2344 = vmatprep.subr.mxu0 %v3467_v40  ;;  %2371 = vmatprep.subr.mxu1 %v3467_v40 }
 0x14e   :  { %2345 = vmatpush3.msra.mxu0 %v3201_v46  ;;  %2372 = vmatpush3.msra.mxu1 %v1465_v6 }
 0x14f   :  { %2346 = vmatprep.subr.mxu0 %v3467_v40  ;;  %2373 = vmatprep.subr.mxu1 %v3467_v40 }
 0x150   :  { %2347 = vmatpush3.msra.mxu0 %v3216_v15  ;;  %2374 = vmatpush3.msra.mxu1 %v1472_v62 }
 0x151   :  { %2348 = vmatprep.subr.mxu0 %v3467_v40  ;;  %2375 = vmatprep.subr.mxu1 %v3467_v40 }
 0x152   :  { %2349 = vmatpush3.msra.mxu0 %v3228_v61  ;;  %2376 = vmatpush3.msra.mxu1 %v1479_v30 }
 0x153   :  { %2351 = vmatmul.mubr.f32.vlgmr.msra.gmra.mxu0 %v1391_v4  ;;  %2377 = vmatprep.subr.mxu1 %v3467_v40 }
 0x154   :  { %2388 = vmatprep.subr.mxu0 %v3467_v40  ;;  %2378 = vmatpush3.msra.mxu1 %v1486_v63 }
 0x155   :  { %2389 = vmatpush3.msra.mxu0 %v3074_v41  ;;  %2379 = vmatprep.subr.mxu1 %v3467_v40 }
 0x156   :  { %2390 = vmatprep.subr.mxu0 %v3467_v40  ;;  %2380 = vmatpush3.msra.mxu1 %v1493_v36 }
 0x157   :  { %2391 = vmatpush3.msra.mxu0 %v3094_v49  ;;  %2381 = vmatprep.subr.mxu1 %v3467_v40 }
 0x158   :  { %2392 = vmatprep.subr.mxu0 %v3467_v40  ;;  %2382 = vmatpush3.msra.mxu1 %v1500_v18 }
 0x159   :  { %2393 = vmatpush3.msra.mxu0 %v3057_v28  ;;  %2383 = vmatprep.subr.mxu1 %v3467_v40 }
 0x15a   :  { %2394 = vmatprep.subr.mxu0 %v3467_v40  ;;  %2384 = vmatpush3.msra.mxu1 %v1507_v59 }
 0x15b   :  { %2395 = vmatpush3.msra.mxu0 %v3071_v1  ;;  %2386 = vmatmul.mubr.f32.vlgmr.msra.gmra.mxu1 %v3177_v29 }
 0x15c   :  { %2396 = vmatprep.subr.mxu0 %v3467_v40  ;;  %2423 = vmatprep.subr.mxu1 %v3467_v40 }
 0x15d   :  { %2397 = vmatpush3.msra.mxu0 %v3089_v7  ;;  %2424 = vmatpush3.msra.mxu1 %v3059_v24 }
 0x15e   :  { %2398 = vmatprep.subr.mxu0 %v3467_v40  ;;  %2425 = vmatprep.subr.mxu1 %v3467_v40 }
 0x15f   :  { %2399 = vmatpush3.msra.mxu0 %v3107_v60  ;;  %2426 = vmatpush3.msra.mxu1 %v3076_v32 }
 0x160   :  { %2400 = vmatprep.subr.mxu0 %v3467_v40  ;;  %2427 = vmatprep.subr.mxu1 %v3467_v40 }
 0x161   :  { %2401 = vmatpush3.msra.mxu0 %v3122_v16  ;;  %2428 = vmatpush3.msra.mxu1 %v3045_v11 }
 0x162   :  { %2402 = vmatprep.subr.mxu0 %v3467_v40  ;;  %2429 = vmatprep.subr.mxu1 %v3467_v40 }
 0x163   :  { %2403 = vmatpush3.msra.mxu0 %v3143_v26  ;;  %2430 = vmatpush3.msra.mxu1 %v3052_v0 }
 0x164   :  { %2404 = vmatprep.subr.mxu0 %v3467_v40  ;;  %2431 = vmatprep.subr.mxu1 %v3467_v40 }
 0x165   :  { %2405 = vmatpush3.msra.mxu0 %v3162_v17  ;;  %2432 = vmatpush3.msra.mxu1 %v3054_v13 }
 0x166   :  { %2406 = vmatprep.subr.mxu0 %v3467_v40  ;;  %2433 = vmatprep.subr.mxu1 %v3467_v40 }
 0x167   :  { %2407 = vmatpush3.msra.mxu0 %v3180_v57  ;;  %2434 = vmatpush3.msra.mxu1 %v3068_v2 }
 0x168   :  { %2408 = vmatprep.subr.mxu0 %v3467_v40  ;;  %2435 = vmatprep.subr.mxu1 %v3467_v40 }
 0x169   :  { %2409 = vmatpush3.msra.mxu0 %v3193_v39  ;;  %2436 = vmatpush3.msra.mxu1 %v3085_v8 }
 0x16a   :  { %2410 = vmatprep.subr.mxu0 %v3467_v40  ;;  %2437 = vmatprep.subr.mxu1 %v3467_v40 }
 0x16b   :  { %2411 = vmatpush3.msra.mxu0 %v3209_v3  ;;  %2438 = vmatpush3.msra.mxu1 %v3103_v14 }
 0x16c   :  { %2412 = vmatprep.subr.mxu0 %v3467_v40  ;;  %2439 = vmatprep.subr.mxu1 %v3467_v40 }
 0x16d   :  { %2413 = vmatpush3.msra.mxu0 %v3221_v58  ;;  %2440 = vmatpush3.msra.mxu1 %v3119_v34 }
 0x16e   :  { %2414 = vmatprep.subr.mxu0 %v3467_v40  ;;  %2441 = vmatprep.subr.mxu1 %v3467_v40 }
 0x16f   :  { %2415 = vmatpush3.msra.mxu0 %v3234_v45  ;;  %2442 = vmatpush3.msra.mxu1 %v3139_v33 }
 0x170   :  { %2416 = vmatprep.subr.mxu0 %v3467_v40  ;;  %2443 = vmatprep.subr.mxu1 %v3467_v40 }
 0x171   :  { %2417 = vmatpush3.msra.mxu0 %v3244_v22  ;;  %2444 = vmatpush3.msra.mxu1 %v3157_v55 }
 0x172   :  { %2418 = vmatprep.subr.mxu0 %v3467_v40  ;;  %2445 = vmatprep.subr.mxu1 %v3467_v40 }
 0x173   :  { %2419 = vmatpush3.msra.mxu0 %v3257_v54  ;;  %2420 = vmatprep.mubr.msk.f32.mxu0 %vm2539_vm2, %v3467_v40 }
 0x174   :  { %2446 = vmatpush3.msra.mxu1 %v3173_v23  ;;  %2421 = vmatmul.mubr.f32.vlgmr.msra.gmra.mxu0 %v3206_v38 }
 0x175   :  { %2447 = vmatprep.subr.mxu1 %v3467_v40  ;;  %2458 = vmatprep.subr.mxu0 %v3467_v40 }
 0x176   :  { %2448 = vmatpush3.msra.mxu1 %v3188_v25  ;;  %2459 = vmatpush3.msra.mxu0 %v1400_v51 }
 0x177   :  { %2449 = vmatprep.subr.mxu1 %v3467_v40  ;;  %2460 = vmatprep.subr.mxu0 %v3467_v40 }
 0x178   :  { %2450 = vmatpush3.msra.mxu1 %v3201_v46  ;;  %2461 = vmatpush3.msra.mxu0 %v1407_v50 }
 0x179   :  { %2451 = vmatprep.subr.mxu1 %v3467_v40  ;;  %2462 = vmatprep.subr.mxu0 %v3467_v40 }
 0x17a   :  { %2452 = vmatpush3.msra.mxu1 %v3216_v15  ;;  %2463 = vmatpush3.msra.mxu0 %v1414_v37  ;;  %v1300_v37 = vpop.permute.xlu0 %1299 }
 0x17b   :  { %2453 = vmatprep.subr.mxu1 %v3467_v40  ;;  %2464 = vmatprep.subr.mxu0 %v3467_v40 }
 0x17c   :  { %2454 = vmatpush3.msra.mxu1 %v3228_v61  ;;  %2455 = vmatprep.mubr.msk.f32.mxu1 %vm2539_vm2, %v3467_v40 }
 0x17d   :  { %2465 = vmatpush3.msra.mxu0 %v1421_v21  ;;  %2456 = vmatmul.mubr.f32.vlgmr.msra.gmra.mxu1 %v1389_v43 }
 0x17e   :  { %2466 = vmatprep.subr.mxu0 %v3467_v40  ;;  %2493 = vmatprep.subr.mxu1 %v3467_v40 }
 0x17f   :  { %2467 = vmatpush3.msra.mxu0 %v1428_v31  ;;  %2494 = vmatpush3.msra.mxu1 %v3059_v24 }
 0x180   :  { %2468 = vmatprep.subr.mxu0 %v3467_v40  ;;  %2495 = vmatprep.subr.mxu1 %v3467_v40 }
 0x181   :  { %2469 = vmatpush3.msra.mxu0 %v1435_v12  ;;  %2496 = vmatpush3.msra.mxu1 %v3076_v32  ;;  %v1302_v32 = vlaneseq }
 0x182   :  { %2470 = vmatprep.subr.mxu0 %v3467_v40  ;;  %2497 = vmatprep.subr.mxu1 %v3467_v40 }
 0x183   :  { %2471 = vmatpush3.msra.mxu0 %v1442_v44  ;;  %2498 = vmatpush3.msra.mxu1 %v3045_v11 }
 0x184   :  { %2472 = vmatprep.subr.mxu0 %v3467_v40  ;;  %2499 = vmatprep.subr.mxu1 %v3467_v40 }
 0x185   :  { %2473 = vmatpush3.msra.mxu0 %v1449_v47  ;;  %2500 = vmatpush3.msra.mxu1 %v3052_v0 }
 0x186   :  { %2474 = vmatprep.subr.mxu0 %v3467_v40  ;;  %2501 = vmatprep.subr.mxu1 %v3467_v40 }
 0x187   :  { %2475 = vmatpush3.msra.mxu0 %v1456_v35  ;;  %2502 = vmatpush3.msra.mxu1 %v3054_v13 }
 0x188   :  { %2476 = vmatprep.subr.mxu0 %v3467_v40  ;;  %2503 = vmatprep.subr.mxu1 %v3467_v40 }
 0x189   :  { %2477 = vmatpush3.msra.mxu0 %v1463_v10  ;;  %2504 = vmatpush3.msra.mxu1 %v3068_v2 }
 0x18a   :  { %2478 = vmatprep.subr.mxu0 %v3467_v40  ;;  %2505 = vmatprep.subr.mxu1 %v3467_v40 }
 0x18b   :  { %2479 = vmatpush3.msra.mxu0 %v1470_v20  ;;  %2506 = vmatpush3.msra.mxu1 %v3085_v8  ;;  %v1303_v8 = vshrl.u32 %v1302_v32, 7 }
 0x18c   :  { %2480 = vmatprep.subr.mxu0 %v3467_v40  ;;  %2507 = vmatprep.subr.mxu1 %v3467_v40 }
 0x18d   :  { %2481 = vmatpush3.msra.mxu0 %v1477_v42  ;;  %2508 = vmatpush3.msra.mxu1 %v3103_v14  ;;  %v1304_v7 = vsub.s32 0, %v1303_v8 }
 0x18e   :  { %2482 = vmatprep.subr.mxu0 %v3467_v40  ;;  %2509 = vmatprep.subr.mxu1 %v3467_v40 }
 0x18f   :  { %2483 = vmatpush3.msra.mxu0 %v1484_v52  ;;  %2510 = vmatpush3.msra.mxu1 %v3119_v34  ;;  %v1305_v51 = vrot.slane %v1300_v37, %v1304_v7 }
 0x190   :  { %2484 = vmatprep.subr.mxu0 %v3467_v40  ;;  %2511 = vmatprep.subr.mxu1 %v3467_v40 }
 0x191   :  { %2485 = vmatpush3.msra.mxu0 %v1491_v19  ;;  %2512 = vmatpush3.msra.mxu1 %v3139_v33 }
 0x192   :  { %2486 = vmatprep.subr.mxu0 %v3467_v40  ;;  %2513 = vmatprep.subr.mxu1 %v3467_v40 }
 0x193   :  { %2487 = vmatpush3.msra.mxu0 %v1498_v5  ;;  %2514 = vmatpush3.msra.mxu1 %v3157_v55 }
 0x194   :  { %2488 = vmatprep.subr.mxu0 %v3467_v40  ;;  %2515 = vmatprep.subr.mxu1 %v3467_v40 }
 0x195   :  { %2489 = vmatpush3.msra.mxu0 %v1505_v53  ;;  %2490 = vmatprep.mubr.msk.f32.mxu0 %vm2539_vm2, %v3467_v40 }
 0x196   :  { %2516 = vmatpush3.msra.mxu1 %v3173_v23  ;;  %2491 = vmatmul.mubr.f32.vlgmr.msra.gmra.mxu0 %v3177_v29 }
 0x197   :  { %2517 = vmatprep.subr.mxu1 %v3467_v40  ;;  %2525 = vmatprep.mubr.msk.f32.mxu1 %vm2539_vm2, %v3467_v40 }
 0x198   :  { %2518 = vmatpush3.msra.mxu1 %v3188_v25 }
 0x199   :  { %2519 = vmatprep.subr.mxu1 %v3467_v40 }
 0x19a   :  { %2520 = vmatpush3.msra.mxu1 %v3201_v46 }
 0x19b   :  { %2521 = vmatprep.subr.mxu1 %v3467_v40 }
 0x19c   :  { %2522 = vmatpush3.msra.mxu1 %v3216_v15 }
 0x19d   :  { %2523 = vmatprep.subr.mxu1 %v3467_v40 }
 0x19e   :  { %2524 = vmatpush3.msra.mxu1 %v3228_v61 }
 0x19f   :  { %2526 = vmatmul.mubr.f32.vlgmr.msra.gmra.mxu1 %v3177_v29 }
 0x213   :  { %v1393_v11 = vpop.f32.mrf.mxu0 }
 0x214   :  { %v1394_v49 = vadd.f32 %v1393_v11, %v1305_v51 }
 0x215   :  { %v2352_v0 = vpop.f32.mrf.mxu0 }
 0x21b   :  { %v1544_v13 = vpop.f32.mrf.mxu1 }
 0x21c   :  { %v1545_v40 = vadd.f32 %v1544_v13, %v1394_v49 }
 0x21d   :  { %v2387_v28 = vpop.f32.mrf.mxu1 }
 0x234   :  { %v1648_v24 = vpop.f32.mrf.mxu0 }
 0x235   :  { %v1649_v21 = vadd.f32 %v1648_v24, %v1545_v40 }
 0x236   :  { %v2422_v2 = vpop.f32.mrf.mxu0 }
 0x23d   :  { %v1737_v1 = vpop.f32.mrf.mxu1 }
 0x23e   :  { %v1738_v50 = vadd.f32 %v1737_v1, %v1649_v21 }
 0x23f   :  { %v2457_v41 = vpop.f32.mrf.mxu1 }
 0x256   :  { %v1856_v14 = vpop.f32.mrf.mxu0 }
 0x257   :  { %v1857_v34 = vadd.f32 %v1856_v14, %v1738_v50 }
 0x258   :  { %v2492_v60 = vpop.f32.mrf.mxu0 }
 0x25f   :  { %v1943_v16 = vpop.f32.mrf.mxu1 }
 0x260   :  { %v1944_v31 = vadd.f32 %v1943_v16, %v1857_v34 }
 0x261   :  { %v2527_v33 = vpop.f32.mrf.mxu1 }
 0x262   :  { %v1947_v26 = vsub.f32 0.0, %v1944_v31 }
 0x264   :  { %v1948_v12 = vmul.f32 1.442695, %v1947_v26 }
 0x266   :  { %2533 = vpow2.f32 %v1948_v12 }
 0x273   :  { %v2534_v55 = vpop.eup %2533 }
 0x274   :  { %v1950_v17 = vadd.f32 1.0, %v2534_v55 }
 0x276   :  { %2535 = vrcp.f32 %v1950_v17 }
 0x283   :  { %v2536_v44 = vpop.eup %2535 }
 0x284   :  { %1953 = vst [vmem:[%s3457_s5] sm:$0x1] %v2536_v44 }

</bundles_post_ra>
